<compile_context>
chip_gen: v5e
topology: v5e:2x2
jax: 0.10.0
libtpu: 0.0.40
codegen_flags: <defaults>
</compile_context>

<pallas_src>
import jax
import jax.numpy as jnp
from jax.experimental import pallas as pl
from jax.experimental.pallas import tpu as pltpu


# ---------------------------------------------------------------------------
# Hardware-aware configuration (computed once, at import time).
# ---------------------------------------------------------------------------
def _num_tensorcores():
    """2 on v7x (megacore split pays off); 1 on single-TC chips (v5e/v6e)."""
    try:
        kind = jax.devices()[0].device_kind.lower()
    except Exception:
        return 1
    return 2 if ("v7" in kind or "tpu7" in kind) else 1


def _vmem_limit_bytes():
    """Generation-aware scoped-VMEM limit with headroom for compiler scratch."""
    try:
        cap = int(pltpu.get_tpu_info().vmem_capacity_bytes)
    except Exception:
        cap = 64 * 1024 * 1024          # conservative (v7x-sized) fallback
    return min((cap * 3) // 4, 96 * 1024 * 1024)


_NCORES = _num_tensorcores()
_VMEM_LIMIT_BYTES = _vmem_limit_bytes()
_MAX_BLOCK_BYTES = 8 * 1024 * 1024      # per-array HBM bytes per grid step


def _cdiv(a, b):
    return -(-a // b)


def _choose_lanes(n):
    """Widest lane count that divides numel (no padding needed), else None."""
    for lanes in (512, 256, 128):
        if n % lanes == 0:
            return lanes
    return None


def _tile_rows_for(rows, lanes, itemsize, arrays_in_flight):
    """Dtype-aware tile height targeting ~8 MiB HBM steps within the VMEM cap."""
    budget = (_VMEM_LIMIT_BYTES * 3 // 4) // (2 * arrays_in_flight)  # 2x buffers
    block_bytes = min(_MAX_BLOCK_BYTES, budget)
    max_rows = max(8, (block_bytes // (lanes * itemsize)) // 8 * 8)
    return max_rows if rows >= max_rows else rows   # full dim is always legal


# ---------------------------------------------------------------------------
# Sum-of-squared-differences kernel (reduction='sum'/'mean').
# ---------------------------------------------------------------------------
def _mse_sum_pallas(p2, t2):
    """Returns sum((p2 - t2)^2) as an f32 scalar (computed in f32)."""
    rows, lanes = p2.shape
    itemsize = max(p2.dtype.itemsize, t2.dtype.itemsize)
    tile_rows = _tile_rows_for(rows, lanes, itemsize, arrays_in_flight=2)
    total_tiles = _cdiv(rows, tile_rows)
    tiles_per_core = _cdiv(total_tiles, _NCORES)
    clamp = tiles_per_core * _NCORES != total_tiles
    needs_mask = clamp or (total_tiles * tile_rows != rows)
    full_tiles = rows // tile_rows               # tiles with no OOB rows
    fold = (tile_rows % 8 == 0) and (tile_rows > 8)
    acc_rows = 8 if fold else tile_rows

    def in_map(c, i):
        t = c * tiles_per_core + i
        if clamp:
            t = jnp.minimum(t, total_tiles - 1)  # never DMA a fully-OOB block
        return (t, 0)

    def kernel(pred_ref, trg_ref, out_ref, acc_ref):
        @pl.when(pl.program_id(1) == 0)
        def _():
            acc_ref[...] = jnp.zeros_like(acc_ref)

        d = pred_ref[...].astype(jnp.float32) - trg_ref[...].astype(jnp.float32)

        def accumulate(v):
            sq = v * v
            if fold:
                # Fold sublane-groups onto a vreg-height accumulator: free view
                # reshape + pure VPU adds (no XLU, no full-tile acc traffic).
                sq = sq.reshape(tile_rows // 8, 8, lanes).sum(axis=0)
            acc_ref[...] += sq

        if needs_mask:
            t_logical = pl.program_id(0) * tiles_per_core + pl.program_id(1)

            @pl.when(t_logical < full_tiles)
            def _():
                accumulate(d)                    # hot path: no mask work

            @pl.when(t_logical >= full_tiles)
            def _():
                # Partial / clamped-duplicate tile: zero OOB rows BEFORE
                # squaring + accumulating (OOB rows may hold stale VMEM bytes).
                row_start = t_logical * tile_rows
                row_ids = jax.lax.broadcasted_iota(
                    jnp.int32, (tile_rows, lanes), 0) + row_start
                accumulate(jnp.where(row_ids < rows, d, 0.0))
        else:
            accumulate(d)

        @pl.when(pl.program_id(1) == pl.num_programs(1) - 1)
        def _():
            # One-time cross-sublane + cross-lane reduce; per-core scalar
            # broadcast across the lane-dense (1, 1, lanes) output row.
            s = jnp.sum(acc_ref[...])
            out_ref[...] = jnp.broadcast_to(s, out_ref.shape)

    partials = pl.pallas_call(
        kernel,
        out_shape=jax.ShapeDtypeStruct((_NCORES, 1, lanes), jnp.float32),
        grid_spec=pltpu.PrefetchScalarGridSpec(
            num_scalar_prefetch=0,
            grid=(_NCORES, tiles_per_core),
            in_specs=[
                pl.BlockSpec((tile_rows, lanes), in_map),
                pl.BlockSpec((tile_rows, lanes), in_map),
            ],
            out_specs=pl.BlockSpec((1, 1, lanes), lambda c, i: (c, 0, 0)),
            scratch_shapes=[pltpu.VMEM((acc_rows, lanes), jnp.float32)],
        ),
        compiler_params=pltpu.CompilerParams(
            dimension_semantics=("parallel", "arbitrary"),
            vmem_limit_bytes=_VMEM_LIMIT_BYTES,
        ),
    )(p2, t2)
    # Per-core scalars live at [:, 0, 0]; epilogue adds _NCORES numbers.
    return jnp.sum(partials[:, 0, 0])


# ---------------------------------------------------------------------------
# Elementwise squared-difference kernel (reduction='none').
# ---------------------------------------------------------------------------
def _sq_diff_pallas(p2, t2, out_dtype):
    rows, lanes = p2.shape
    itemsize = max(p2.dtype.itemsize, t2.dtype.itemsize,
                   jnp.dtype(out_dtype).itemsize)
    tile_rows = _tile_rows_for(rows, lanes, itemsize, arrays_in_flight=3)
    total_tiles = _cdiv(rows, tile_rows)

    def kernel(pred_ref, trg_ref, out_ref):
        d = pred_ref[...].astype(jnp.float32) - trg_ref[...].astype(jnp.float32)
        out_ref[...] = (d * d).astype(out_ref.dtype)

    return pl.pallas_call(
        kernel,
        out_shape=jax.ShapeDtypeStruct((rows, lanes), out_dtype),
        grid_spec=pltpu.PrefetchScalarGridSpec(
            num_scalar_prefetch=0,
            grid=(total_tiles,),
            in_specs=[
                pl.BlockSpec((tile_rows, lanes), lambda i: (i, 0)),
                pl.BlockSpec((tile_rows, lanes), lambda i: (i, 0)),
            ],
            out_specs=pl.BlockSpec((tile_rows, lanes), lambda i: (i, 0)),
        ),
        compiler_params=pltpu.CompilerParams(
            dimension_semantics=("parallel",),
            vmem_limit_bytes=_VMEM_LIMIT_BYTES,
        ),
    )(p2, t2)


# ---------------------------------------------------------------------------
# Public wrapper (call the jitted `mse_loss` so the tiny epilogue fuses).
# ---------------------------------------------------------------------------
def mse_loss_pallas(pred, trg, reduction="mean"):
    assert pred.shape == trg.shape, "pred/trg must have the same shape"
    if reduction not in ("mean", "sum", "none"):
        raise ValueError(f"unknown reduction: {reduction}")

    n = int(pred.size)
    out_dtype = jnp.result_type(pred.dtype, trg.dtype)
    lanes = _choose_lanes(n)

    if reduction == "none":
        if lanes is None:
            # TODO(synk): rare ragged case (numel % 128 != 0) — pad the flat
            # tensors (one extra HBM pass); a lane-dense 2-D view needs lanes|n.
            lanes = 128
            pad = (-n) % lanes
            p2 = jnp.pad(pred.reshape(-1), (0, pad)).reshape(-1, lanes)
            t2 = jnp.pad(trg.reshape(-1), (0, pad)).reshape(-1, lanes)
            out2d = _sq_diff_pallas(p2, t2, out_dtype)
            return out2d.reshape(-1)[:n].reshape(pred.shape)
        p2 = pred.reshape(n // lanes, lanes)
        t2 = trg.reshape(n // lanes, lanes)
        return _sq_diff_pallas(p2, t2, out_dtype).reshape(pred.shape)

    # reduction in ("mean", "sum")
    if lanes is None:
        # Ragged numel: stream the main slab through the kernel and handle the
        # <128-element tail in plain JAX instead of re-writing the tensors.
        lanes = 128
        n_main = (n // lanes) * lanes
        pf = pred.reshape(-1)
        tf = trg.reshape(-1)
        d_tail = pf[n_main:].astype(jnp.float32) - tf[n_main:].astype(jnp.float32)
        tail = jnp.sum(d_tail * d_tail)
        if n_main == 0:
            total = tail
        else:
            # TODO(synk): the [:n_main] slice may still copy under XLA; a
            # manual-DMA tail would avoid it, but this case is rare.
            p2 = pf[:n_main].reshape(n_main // lanes, lanes)
            t2 = tf[:n_main].reshape(n_main // lanes, lanes)
            total = _mse_sum_pallas(p2, t2) + tail
    else:
        p2 = pred.reshape(n // lanes, lanes)
        t2 = trg.reshape(n // lanes, lanes)
        total = _mse_sum_pallas(p2, t2)

    if reduction == "mean":
        total = total / n
    return total.astype(out_dtype)


mse_loss = jax.jit(mse_loss_pallas, static_argnames=("reduction",))


if __name__ == "__main__":
    key = jax.random.PRNGKey(0)
    k_pred, k_trg = jax.random.split(key)
    # NCHW-like shapes, as PyTorch would feed: batch=2, channels=4, spatial=16x16
    pred = jax.random.normal(k_pred, (2, 4, 16, 16), dtype=jnp.float32)
    trg = jax.random.normal(k_trg, (2, 4, 16, 16), dtype=jnp.float32)

    loss_mean = jax.block_until_ready(mse_loss(pred, trg, reduction="mean"))
    loss_sum = jax.block_until_ready(mse_loss(pred, trg, reduction="sum"))
    loss_none = jax.block_until_ready(mse_loss(pred, trg, reduction="none"))

    d = pred - trg
    ref_mean = jnp.mean(d * d)
    ref_sum = jnp.sum(d * d)
    ref_none = d * d
    assert jnp.allclose(loss_mean, ref_mean, rtol=1e-5, atol=1e-6), (loss_mean, ref_mean)
    assert jnp.allclose(loss_sum, ref_sum, rtol=1e-5, atol=1e-4), (loss_sum, ref_sum)
    assert jnp.allclose(loss_none, ref_none, rtol=1e-5, atol=1e-6)

    print("KERNEL_OK")
</pallas_src>

<mosaic_0001>
module attributes {stable_mosaic.version = 11 : i64} {
  func.func @kernel(%arg0: i32, %arg1: i32, %arg2: memref<4x512xf32, #tpu.memory_space<vmem>>, %arg3: memref<4x512xf32, #tpu.memory_space<vmem>>, %arg4: memref<1x1x512xf32, #tpu.memory_space<vmem>>, %arg5: memref<4x512xf32, #tpu.memory_space<vmem>>) attributes {dimension_semantics = [#tpu.dimension_semantics<parallel>, #tpu.dimension_semantics<arbitrary>], iteration_bounds = array<i64: 1, 1>, scalar_prefetch = 0 : i64, scratch_operands = 1 : i64, tpu.core_type = #tpu.core_type<tc>, window_params = [{transform_indices = @transform_0, window_bounds = array<i64: 4, 512>}, {transform_indices = @transform_1, window_bounds = array<i64: 4, 512>}, {transform_indices = @transform_2, window_bounds = array<i64: 1, 1, 512>}]} {
    %c0_i32 = arith.constant 0 : i32
    %0 = arith.cmpi eq, %arg1, %c0_i32 : i32
    %1 = arith.extui %0 : i1 to i32
    %c0_i32_0 = arith.constant 0 : i32
    %2 = arith.cmpi ne, %1, %c0_i32_0 : i32
    scf.if %2 {
      %cst = arith.constant 0.000000e+00 : f32
      %13 = vector.broadcast %cst : f32 to vector<4x512xf32>
      %c0_10 = arith.constant 0 : index
      %c0_11 = arith.constant 0 : index
      %14 = vector.load %arg5[%c0_10, %c0_11] : memref<4x512xf32, #tpu.memory_space<vmem>>, vector<4x512xf32>
      tpu.vector_store %arg5[%c0_10, %c0_11], %13 {strides = array<i32>} : memref<4x512xf32, #tpu.memory_space<vmem>>, vector<4x512xf32>,
    } else {
    }
    %c0 = arith.constant 0 : index
    %c0_1 = arith.constant 0 : index
    %3 = vector.load %arg2[%c0, %c0_1] : memref<4x512xf32, #tpu.memory_space<vmem>>, vector<4x512xf32>
    %c0_2 = arith.constant 0 : index
    %c0_3 = arith.constant 0 : index
    %4 = vector.load %arg3[%c0_2, %c0_3] : memref<4x512xf32, #tpu.memory_space<vmem>>, vector<4x512xf32>
    %5 = arith.subf %3, %4 : vector<4x512xf32>
    %6 = arith.mulf %5, %5 : vector<4x512xf32>
    %c0_4 = arith.constant 0 : index
    %c0_5 = arith.constant 0 : index
    %7 = vector.load %arg5[%c0_4, %c0_5] : memref<4x512xf32, #tpu.memory_space<vmem>>, vector<4x512xf32>
    %8 = arith.addf %7, %6 : vector<4x512xf32>
    %c0_6 = arith.constant 0 : index
    %c0_7 = arith.constant 0 : index
    %9 = vector.load %arg5[%c0_6, %c0_7] : memref<4x512xf32, #tpu.memory_space<vmem>>, vector<4x512xf32>
    tpu.vector_store %arg5[%c0_6, %c0_7], %8 {strides = array<i32>} : memref<4x512xf32, #tpu.memory_space<vmem>>, vector<4x512xf32>,
    %c0_i32_8 = arith.constant 0 : i32
    %10 = arith.cmpi eq, %arg1, %c0_i32_8 : i32
    %11 = arith.extui %10 : i1 to i32
    %c0_i32_9 = arith.constant 0 : i32
    %12 = arith.cmpi ne, %11, %c0_i32_9 : i32
    scf.if %12 {
      %c0_10 = arith.constant 0 : index
      %c0_11 = arith.constant 0 : index
      %13 = vector.load %arg5[%c0_10, %c0_11] : memref<4x512xf32, #tpu.memory_space<vmem>>, vector<4x512xf32>
      %14 = vector.shape_cast %13 : vector<4x512xf32> to vector<1x4x512xf32>
      %cst = arith.constant dense<0.000000e+00> : vector<1xf32>
      %15 = vector.multi_reduction <add>, %14, %cst [1, 2] : vector<1x4x512xf32> to vector<1xf32>
      %16 = vector.shape_cast %15 : vector<1xf32> to vector<1x1x1xf32>
      %17 = vector.extract %16[0, 0, 0] : f32 from vector<1x1x1xf32>
      %18 = vector.broadcast %17 : f32 to vector<1x1x512xf32>
      %c0_12 = arith.constant 0 : index
      %c0_13 = arith.constant 0 : index
      %c0_14 = arith.constant 0 : index
      %19 = vector.load %arg4[%c0_12, %c0_13, %c0_14] : memref<1x1x512xf32, #tpu.memory_space<vmem>>, vector<1x1x512xf32>
      tpu.vector_store %arg4[%c0_12, %c0_13, %c0_14], %18 {strides = array<i32>} : memref<1x1x512xf32, #tpu.memory_space<vmem>>, vector<1x1x512xf32>,
    } else {
    }
    return
  }
  func.func @transform_0(%arg0: i32, %arg1: i32) -> (i32, i32) {
    %c1_i32 = arith.constant 1 : i32
    %0 = arith.muli %arg0, %c1_i32 : i32
    %1 = arith.addi %0, %arg1 : i32
    %c0_i32 = arith.constant 0 : i32
    %c0_i32_0 = arith.constant 0 : i32
    return %1, %c0_i32 : i32, i32
  }
  func.func @transform_1(%arg0: i32, %arg1: i32) -> (i32, i32) {
    %c1_i32 = arith.constant 1 : i32
    %0 = arith.muli %arg0, %c1_i32 : i32
    %1 = arith.addi %0, %arg1 : i32
    %c0_i32 = arith.constant 0 : i32
    %c0_i32_0 = arith.constant 0 : i32
    return %1, %c0_i32 : i32, i32
  }
  func.func @transform_2(%arg0: i32, %arg1: i32) -> (i32, i32, i32) {
    %c0_i32 = arith.constant 0 : i32
    %c0_i32_0 = arith.constant 0 : i32
    %c0_i32_1 = arith.constant 0 : i32
    return %arg0, %c0_i32, %c0_i32_0 : i32, i32, i32
  }
}

</mosaic_0001>

<bundles_post_ra>
// kernel: mse_loss_pallas.1
= control target key start
LH: loop header
LB: loop body
LE: loop exit
PB: predicated region body
PF: predicated region fallthrough
CT: control target
= control target key end

     0   :  { %vm89_vm0 = vcmask 1043456   ;;  %v107_v26 = vlaneseq  ;;  %s160_s0 = inlined_call_operand.vmem [shape: f32[4,512], index: 0, kind: input, shape index: {}]   ;;  %s161_s1 = inlined_call_operand.vmem [shape: f32[4,512], index: 1, kind: input, shape index: {}]   ;;  %s162_s2 = inlined_call_operand.vmem [shape: f32[1,1,512], index: 2, kind: output, shape index: {}]  }
   0x1   :  { %v57_v0 = vld [vmem:[%s160_s0] sm:$0xff]  ;;  %v58_v1 = vld [vmem:[%s160_s0 + $0x8] sm:$0xff] }
   0x2   :  { %v59_v2 = vld [vmem:[%s161_s1] sm:$0xff]  ;;  %v60_v3 = vld [vmem:[%s161_s1 + $0x8] sm:$0xff]  ;;  %vm109_vm1 = vcmp.lt.s32.totalorder %v107_v26, 512 }
   0x3   :  { %v61_v4 = vsub.f32 %v57_v0, %v59_v2  ;;  %v62_v5 = vsub.f32 %v58_v1, %v60_v3 }
   0x5   :  { %v63_v6 = vmul.f32 %v61_v4, %v61_v4  ;;  %v64_v7 = vmul.f32 %v62_v5, %v62_v5 }
   0x7   :  { %78 = vst [vmem:[#allocation1] ss:$2 sm:$0xff] %v63_v6 }
   0x8   :  { %80 = vst [vmem:[#allocation1 + $0x10] ss:$2 sm:$0xff] %v64_v7 }
   0xe   :  { %v81_v8 = vld.sshfl [vmem:[#allocation1] sm:$0xff pattern:$0x75316420]  ;;  %v82_v9 = vld.sshfl [vmem:[#allocation1 + $0x8] sm:$0xff pattern:$0x75316420] }
   0xf   :  { %v83_v10 = vld.sshfl [vmem:[#allocation1 + $0x10] sm:$0xff pattern:$0x75316420]  ;;  %v84_v11 = vld.sshfl [vmem:[#allocation1 + $0x18] sm:$0xff pattern:$0x75316420] }
  0x10   :  { %v90_v12 = vsel %vm89_vm0, %v81_v8, 0.0  ;;  %v91_v13 = vsel %vm89_vm0, %v82_v9, 0.0  ;;  %v93_v14 = vsel %vm89_vm0, %v83_v10, 0.0  ;;  %v95_v16 = vsel %vm89_vm0, %v84_v11, 0.0 }
  0x11   :  { %v92_v15 = vadd.f32 %v91_v13, %v90_v12 }
  0x13   :  { %v94_v17 = vadd.f32 %v93_v14, %v92_v15 }
  0x15   :  { %v96_v18 = vadd.f32 %v95_v16, %v94_v17 }
  0x17   :  { %97 = vadd.xlane.f32.xlu0 %v96_v18 }
  0x8a   :  { %v98_v19 = vpop.xlane.xlu0 %97 }
  0x8b   :  { %v99_v20 = vrot.slane %v98_v19, 4 }
  0x8d   :  { %v100_v21 = vadd.f32 %v99_v20, %v98_v19 }
  0x8f   :  { %v101_v22 = vrot.slane %v100_v21, 2 }
  0x91   :  { %v102_v23 = vadd.f32 %v101_v22, %v100_v21 }
  0x93   :  { %v103_v24 = vrot.slane %v102_v23, 1 }
  0x95   :  { %v104_v25 = vadd.f32 %v103_v24, %v102_v23 }
  0x97   :  { %128 = vpush %v104_v25 }
  0xc8   :  { %s129_s0 = spop %128 }
  0xc9   :  { %v106_v27 = vstv %s129_s0 }
  0xca   :  { %111 = vst.msk [vmem:[%s162_s2] sm:$0xf] %vm109_vm1, %v106_v27 }

</bundles_post_ra>
